<compile_context>
chip_gen: v5e
topology: v5e:2x2
jax: 0.10.0
libtpu: 0.0.40
codegen_flags: <defaults>
</compile_context>

<pallas_src>
import numpy as np
import jax
import jax.numpy as jnp
from jax import lax
from jax.experimental import pallas as pl
from jax.experimental.pallas import tpu as pltpu

NUM_QUBITS = 4
DEPTH = 2
HDIM = 2 ** NUM_QUBITS          # len(hamiltonian_matrix) == 16
PACK = 128                      # packed lane width (>= 2*HDIM), one vreg wide


# ----------------------------------------------------------------------------
# The single fused kernel: 2 packed complex affines + argmax "measurement"
# ----------------------------------------------------------------------------
def hybrid_fused_kernel(x_ref, we_ref, be_ref, wd_ref, bd_ref, out_ref):
    x = x_ref[...]                                              # (1, PACK) f32

    # ---- folded ClassicalEncoder (4 layers) + circuit unitary: one affine ----
    psi = jnp.dot(x, we_ref[...], preferred_element_type=jnp.float32) + be_ref[...]

    # ---- deterministic "measurement": most likely basis state ----
    # (qc.initialize normalization removed: argmax of |amp|^2 is scale-invariant)
    # Re amplitudes live in lanes [0,16), Im in [16,32), everything else is
    # exactly zero, so the symmetric double roll folds im^2 onto the real lanes
    # regardless of roll-direction convention (other lanes masked below).
    p2 = psi * psi
    folded = (p2
              + pltpu.roll(p2, shift=HDIM, axis=1)
              + pltpu.roll(p2, shift=PACK - HDIM, axis=1))
    lane = lax.broadcasted_iota(jnp.int32, (1, PACK), 1)
    probs = jnp.where(lane < HDIM, folded, -1.0)
    pmax = jnp.max(probs, axis=1, keepdims=True)                # (1, 1)
    idx = jnp.min(jnp.where(probs == pmax,
                            lane.astype(jnp.float32),
                            float(PACK)),
                  axis=1, keepdims=True).astype(jnp.int32)      # first max, (1,1)

    # ---- vectorized bit extraction (bit k of the basis index, little-endian,
    #      matching output_bitstring[::-1] in the reference) ----
    shift = jnp.minimum(lane, NUM_QUBITS)                       # clamp shift amt
    bits = jnp.bitwise_and(jnp.right_shift(idx, shift), 1).astype(jnp.float32)
    d = jnp.where(lane < NUM_QUBITS, bits, 0.0)                 # (1, PACK)

    # ---- folded ClassicalDecoder (6 layers): one affine ----
    out_ref[...] = (jnp.dot(d, wd_ref[...], preferred_element_type=jnp.float32)
                    + bd_ref[...])                              # lane-dense store


def hybrid_forward(x_packed, w_enc, b_enc, w_dec, b_dec):
    vmem = pl.BlockSpec(memory_space=pltpu.MemorySpace.VMEM)
    y = pl.pallas_call(
        hybrid_fused_kernel,
        out_shape=jax.ShapeDtypeStruct((1, PACK), jnp.float32),
        in_specs=[vmem, vmem, vmem, vmem, vmem],
        out_specs=vmem,
    )(x_packed, w_enc, b_enc, w_dec, b_dec)
    return y[:, :HDIM], y[:, HDIM:2 * HDIM]


# ----------------------------------------------------------------------------
# Deterministic parameter init + host-side (complex128) folding + packing
# ----------------------------------------------------------------------------
def init_complex_linear(key, in_f, out_f):
    """Synthetic complex Linear (row-vector convention y = x @ W + b)."""
    k1, k2, k3, k4 = jax.random.split(key, 4)
    scale = 1.0 / np.sqrt(in_f)
    wr = np.asarray(jax.random.uniform(k1, (in_f, out_f), jnp.float32, -scale, scale), np.float64)
    wi = np.asarray(jax.random.uniform(k2, (in_f, out_f), jnp.float32, -scale, scale), np.float64)
    br = np.asarray(jax.random.uniform(k3, (out_f,), jnp.float32, -scale, scale), np.float64)
    bi = np.asarray(jax.random.uniform(k4, (out_f,), jnp.float32, -scale, scale), np.float64)
    return wr + 1j * wi, br + 1j * bi           # complex128


def fold_affine_chain(layers):
    """Fold y = (...((x W1 + b1) W2 + b2)...) into one affine (A, c), complex128."""
    A, c = layers[0]
    A = A.copy(); c = c.copy()
    for W, b in layers[1:]:
        A = A @ W
        c = c @ W + b
    return A, c


def pack_affine(A, c):
    """Complex affine -> real (PACK, PACK) weight + (1, PACK) bias so that
    [Re(x)|Im(x)|0] @ W + B = [Re(y)|Im(y)|0]."""
    in_f, out_f = A.shape
    W = np.zeros((PACK, PACK), np.float64)
    W[:in_f, :out_f] = A.real
    W[:in_f, out_f:2 * out_f] = A.imag
    W[in_f:2 * in_f, :out_f] = -A.imag
    W[in_f:2 * in_f, out_f:2 * out_f] = A.real
    B = np.zeros((1, PACK), np.float64)
    B[0, :out_f] = c.real
    B[0, out_f:2 * out_f] = c.imag
    return jnp.asarray(W, jnp.float32), jnp.asarray(B, jnp.float32)


def build_params(key, circuit_U):
    enc_dims = [(HDIM, 128), (128, 64), (64, 32), (32, 16)]
    dec_dims = [(4, 8), (8, 16), (16, 32), (32, 64), (64, 128), (128, HDIM)]
    keys = jax.random.split(key, len(enc_dims) + len(dec_dims))
    enc_layers = [init_complex_linear(keys[i], *d) for i, d in enumerate(enc_dims)]
    dec_layers = [init_complex_linear(keys[len(enc_dims) + i], *d)
                  for i, d in enumerate(dec_dims)]

    # Fold encoder chain, then the constant circuit unitary (row convention:
    # psi_row = state_row @ U^T).  The qc.initialize normalization is NOT
    # folded: the downstream argmax of |amplitude|^2 is scale-invariant.
    A_enc, c_enc = fold_affine_chain(enc_layers)
    A_encU = A_enc @ circuit_U.T
    c_encU = c_enc @ circuit_U.T

    A_dec, c_dec = fold_affine_chain(dec_layers)

    w_enc, b_enc = pack_affine(A_encU, c_encU)     # (128,128), (1,128)
    w_dec, b_dec = pack_affine(A_dec, c_dec)       # (128,128), (1,128)
    return w_enc, b_enc, w_dec, b_dec


# ----------------------------------------------------------------------------
# Quantum circuit: rotation angles are fixed nn.Parameters, so the circuit
# collapses to one constant 16x16 unitary, precomputed host-side (complex128).
# TODO(synk): the qiskit 2048-shot sampling + most-frequent-bitstring step is
# stochastic; replaced by deterministic argmax of exact |amplitude|^2.
# ----------------------------------------------------------------------------
def build_circuit_unitary(num_qubits, depth, params):
    dim = 2 ** num_qubits
    X = np.array([[0, 1], [1, 0]], dtype=np.complex128)

    def single(gate, q):
        # qiskit ordering: qubit 0 is least-significant (rightmost kron factor)
        full = np.eye(1, dtype=np.complex128)
        for k in range(num_qubits - 1, -1, -1):
            full = np.kron(full, gate if k == q else np.eye(2, dtype=np.complex128))
        return full

    def two_adjacent(gate4, q):  # acts on qubits q (low) and q+1 (high)
        full = np.eye(1, dtype=np.complex128)
        k = num_qubits - 1
        while k >= 0:
            if k == q + 1:
                full = np.kron(full, gate4)
                k -= 2
            else:
                full = np.kron(full, np.eye(2, dtype=np.complex128))
                k -= 1
        return full

    U = np.eye(dim, dtype=np.complex128)
    pc = 0
    for _ in range(depth):
        for q in range(num_qubits):
            for name in ("rz", "rx", "rz"):
                th = float(params[pc]); pc += 1
                if name == "rz":
                    g = np.diag([np.exp(-1j * th / 2), np.exp(1j * th / 2)])
                else:
                    c, s = np.cos(th / 2), np.sin(th / 2)
                    g = np.array([[c, -1j * s], [-1j * s, c]], dtype=np.complex128)
                U = single(g, q) @ U
        for q in range(num_qubits - 1):
            th = float(params[pc]); pc += 1
            c, s = np.cos(th / 2), np.sin(th / 2)
            g4 = c * np.eye(4, dtype=np.complex128) - 1j * s * np.kron(X, X)
            U = two_adjacent(g4, q) @ U
    return U


if __name__ == "__main__":
    key = jax.random.PRNGKey(0)
    k_params, k_theta, k_xr, k_xi = jax.random.split(key, 4)

    # quantum circuit rotation parameters: rand * 0.01 (as in the torch module)
    n_theta = 3 * NUM_QUBITS * DEPTH + DEPTH * (NUM_QUBITS - 1)
    theta = np.asarray(jax.random.uniform(k_theta, (n_theta,), jnp.float32)) * 0.01
    U = build_circuit_unitary(NUM_QUBITS, DEPTH, theta)

    # folded + packed parameters (encoder+unitary affine, decoder affine)
    w_enc, b_enc, w_dec, b_dec = build_params(k_params, U)

    # input: complex vector of length len(hamiltonian_matrix) == 16
    xr = jax.random.normal(k_xr, (1, HDIM), jnp.float32)
    xi = jax.random.normal(k_xi, (1, HDIM), jnp.float32)
    x_packed = jnp.zeros((1, PACK), jnp.float32)
    x_packed = x_packed.at[:, :HDIM].set(xr).at[:, HDIM:2 * HDIM].set(xi)

    fwd = jax.jit(hybrid_forward)
    out_r, out_i = fwd(x_packed, w_enc, b_enc, w_dec, b_dec)
    jax.block_until_ready((out_r, out_i))
    assert out_r.shape == (1, HDIM) and out_i.shape == (1, HDIM)
    assert bool(jnp.all(jnp.isfinite(out_r))) and bool(jnp.all(jnp.isfinite(out_i)))
    print("KERNEL_OK")
</pallas_src>

<mosaic_0001>
module attributes {stable_mosaic.version = 11 : i64} {
  func.func @hybrid_fused_kernel(%arg0: memref<1x128xf32, #tpu.memory_space<vmem>>, %arg1: memref<128x128xf32, #tpu.memory_space<vmem>>, %arg2: memref<1x128xf32, #tpu.memory_space<vmem>>, %arg3: memref<128x128xf32, #tpu.memory_space<vmem>>, %arg4: memref<1x128xf32, #tpu.memory_space<vmem>>, %arg5: memref<1x128xf32, #tpu.memory_space<vmem>>) attributes {dimension_semantics = [], scalar_prefetch = 0 : i64, scratch_operands = 0 : i64, tpu.core_type = #tpu.core_type<tc>} {
    %c0 = arith.constant 0 : index
    %c0_0 = arith.constant 0 : index
    %0 = vector.load %arg0[%c0, %c0_0] : memref<1x128xf32, #tpu.memory_space<vmem>>, vector<1x128xf32>
    %c0_1 = arith.constant 0 : index
    %c0_2 = arith.constant 0 : index
    %1 = vector.load %arg1[%c0_1, %c0_2] : memref<128x128xf32, #tpu.memory_space<vmem>>, vector<128x128xf32>
    %cst = arith.constant dense<0.000000e+00> : vector<1x128xf32>
    %2 = tpu.matmul %0, %1, %cst {dimension_numbers = #tpu.dot_dimension_numbers<[1], [0], [0], [1], [0, 0, 1, 1], [], []>} : vector<1x128xf32>, vector<128x128xf32>, vector<1x128xf32> -> vector<1x128xf32>
    %c0_3 = arith.constant 0 : index
    %c0_4 = arith.constant 0 : index
    %3 = vector.load %arg2[%c0_3, %c0_4] : memref<1x128xf32, #tpu.memory_space<vmem>>, vector<1x128xf32>
    %4 = arith.addf %2, %3 : vector<1x128xf32>
    %5 = arith.mulf %4, %4 : vector<1x128xf32>
    %c16_i32 = arith.constant 16 : i32
    %6 = tpu.dynamic_rotate %5 by %c16_i32 dim 1 : vector<1x128xf32>, i32 -> vector<1x128xf32>
    %7 = arith.addf %5, %6 : vector<1x128xf32>
    %c112_i32 = arith.constant 112 : i32
    %8 = tpu.dynamic_rotate %5 by %c112_i32 dim 1 : vector<1x128xf32>, i32 -> vector<1x128xf32>
    %9 = arith.addf %7, %8 : vector<1x128xf32>
    %10 = tpu.iota {dimensions = array<i32: 1>} : vector<1x128xi32>
    %c16_i32_5 = arith.constant 16 : i32
    %11 = vector.broadcast %c16_i32_5 : i32 to vector<1x128xi32>
    %12 = arith.cmpi slt, %10, %11 : vector<1x128xi32>
    %cst_6 = arith.constant -1.000000e+00 : f32
    %13 = vector.broadcast %cst_6 : f32 to vector<1x128xf32>
    %14 = arith.select %12, %9, %13 : vector<1x128xi1>, vector<1x128xf32>
    %cst_7 = arith.constant dense<0xFF800000> : vector<1xf32>
    %15 = vector.multi_reduction <maximumf>, %14, %cst_7 [1] : vector<1x128xf32> to vector<1xf32>
    %16 = vector.shape_cast %15 : vector<1xf32> to vector<1x1xf32>
    %17 = vector.broadcast %16 : vector<1x1xf32> to vector<1x128xf32>
    %18 = arith.cmpf oeq, %14, %17 : vector<1x128xf32>
    %19 = arith.sitofp %10 : vector<1x128xi32> to vector<1x128xf32>
    %cst_8 = arith.constant 1.280000e+02 : f32
    %20 = vector.broadcast %cst_8 : f32 to vector<1x128xf32>
    %21 = arith.select %18, %19, %20 : vector<1x128xi1>, vector<1x128xf32>
    %cst_9 = arith.constant dense<0x7F800000> : vector<1xf32>
    %22 = vector.multi_reduction <minimumf>, %21, %cst_9 [1] : vector<1x128xf32> to vector<1xf32>
    %23 = vector.shape_cast %22 : vector<1xf32> to vector<1x1xf32>
    %24 = arith.fptosi %23 : vector<1x1xf32> to vector<1x1xi32>
    %c4_i32 = arith.constant 4 : i32
    %25 = vector.broadcast %c4_i32 : i32 to vector<1x128xi32>
    %26 = arith.minsi %10, %25 : vector<1x128xi32>
    %27 = vector.broadcast %24 : vector<1x1xi32> to vector<1x128xi32>
    %28 = arith.shrsi %27, %26 : vector<1x128xi32>
    %c1_i32 = arith.constant 1 : i32
    %29 = vector.broadcast %c1_i32 : i32 to vector<1x128xi32>
    %30 = arith.andi %28, %29 : vector<1x128xi32>
    %31 = arith.sitofp %30 : vector<1x128xi32> to vector<1x128xf32>
    %c4_i32_10 = arith.constant 4 : i32
    %32 = vector.broadcast %c4_i32_10 : i32 to vector<1x128xi32>
    %33 = arith.cmpi slt, %10, %32 : vector<1x128xi32>
    %cst_11 = arith.constant 0.000000e+00 : f32
    %34 = vector.broadcast %cst_11 : f32 to vector<1x128xf32>
    %35 = arith.select %33, %31, %34 : vector<1x128xi1>, vector<1x128xf32>
    %c0_12 = arith.constant 0 : index
    %c0_13 = arith.constant 0 : index
    %36 = vector.load %arg3[%c0_12, %c0_13] : memref<128x128xf32, #tpu.memory_space<vmem>>, vector<128x128xf32>
    %cst_14 = arith.constant dense<0.000000e+00> : vector<1x128xf32>
    %37 = tpu.matmul %35, %36, %cst_14 {dimension_numbers = #tpu.dot_dimension_numbers<[1], [0], [0], [1], [0, 0, 1, 1], [], []>} : vector<1x128xf32>, vector<128x128xf32>, vector<1x128xf32> -> vector<1x128xf32>
    %c0_15 = arith.constant 0 : index
    %c0_16 = arith.constant 0 : index
    %38 = vector.load %arg4[%c0_15, %c0_16] : memref<1x128xf32, #tpu.memory_space<vmem>>, vector<1x128xf32>
    %39 = arith.addf %37, %38 : vector<1x128xf32>
    %c0_17 = arith.constant 0 : index
    %c0_18 = arith.constant 0 : index
    %40 = vector.load %arg5[%c0_17, %c0_18] : memref<1x128xf32, #tpu.memory_space<vmem>>, vector<1x128xf32>
    tpu.vector_store %arg5[%c0_17, %c0_18], %39 {strides = array<i32>} : memref<1x128xf32, #tpu.memory_space<vmem>>, vector<1x128xf32>,
    return
  }
}

</mosaic_0001>

<bundles_post_ra>
// kernel: hybrid_forward.1
= control target key start
LH: loop header
LB: loop body
LE: loop exit
PB: predicated region body
PF: predicated region fallthrough
CT: control target
= control target key end

     0   :  { %10 = vsyncpa [#allocation3], 0  ;;  %s322_s0 = inlined_call_operand.hbm [shape: f32[1,128], index: 0, kind: input, shape index: {}]   ;;  %s323_s1 = inlined_call_operand.hbm [shape: f32[128,128], index: 1, kind: input, shape index: {}]   ;;  %s324_s2 = inlined_call_operand.vmem [shape: f32[1,128], index: 2, kind: input, shape index: {}]   ;;  %s325_s3 = inlined_call_operand.hbm [shape: f32[128,128], index: 3, kind: input, shape index: {}]   ;;  %s326_s4 = inlined_call_operand.vmem [shape: f32[1,128], index: 4, kind: input, shape index: {}]   ;;  %s327_s5 = inlined_call_operand.vmem [shape: f32[1,128], index: 5, kind: output, shape index: {}]  }
   0x1   :  { %11 = vsyncpa [#allocation5], 0  ;;  %s27_s20 = sshll.u32 %s323_s1, 4  ;;  %s265_s21 = smov [#allocation4]   ;;  %s28_s20 = int_to_ptr.hbm [resolvable:$true] %s27_s20 }
   0x2   :  { %s29_s22 = sshll.u32 %s265_s21, 4  ;;  %s17_s25 = sshll.u32 %s322_s0, 4  ;;  %s30_s22 = int_to_ptr.vmem [resolvable:$true] %s29_s22  ;;  %s18_s25 = int_to_ptr.hbm [resolvable:$true] %s17_s25 }
   0x3   :  { %s266_s26 = smov 128   ;;  %s267_s27 = smov 8  }
   0x4   :  { %35 = dma.hbm_to_vmem [thread:$0]  %s28_s20, 2048, %s30_s22, [#allocation5], %s266_s26, %s266_s26, %s267_s27  }
   0x5   :  { %s268_s28 = smov [#allocation2]   ;;  %s42_s7 = sshll.u32 %s325_s3, 4  ;;  %s43_s7 = int_to_ptr.hbm [resolvable:$true] %s42_s7 }
   0x6   :  { %s19_s29 = sshll.u32 %s268_s28, 4  ;;  %s269_s1 = smov [#allocation6]   ;;  %s20_s29 = int_to_ptr.vmem [resolvable:$true] %s19_s29 }
   0x7   :  { %22 = dma.hbm_to_vmem [thread:$0]  %s18_s25, 16, %s20_s29, [#allocation3]  }
   0x8   :  { %s44_s8 = sshll.u32 %s269_s1, 4  ;;  %s45_s8 = int_to_ptr.vmem [resolvable:$true] %s44_s8 }
   0x9   :  { %50 = dma.hbm_to_vmem [thread:$0]  %s43_s7, 2048, %s45_s8, [#allocation5], %s266_s26, %s266_s26, %s267_s27  }
   0xa   :  { %261 = dma.done.wait [#allocation3], 16  }
   0xb   :  { %262 = vsyncadd [#allocation3], 4294967280 }
   0xc   :  { %263 = dma.done.wait [#allocation5], 4096  }
   0xd   :  { %264 = vsyncadd [#allocation5], 4294963200  ;;  %v81_v0 = vld [vmem:[#allocation4 + $0x78] sm:$0xff]  ;;  %v80_v1 = vld [vmem:[#allocation4 + $0x70] sm:$0xff]  ;;  %s270_s9 = smov 16   ;;  %s271_s10 = smov 112   ;;  %v110_v22 = vlaneseq }
   0xe   :  { %83 = vmatpush.msra.mxu0 %v81_v0  ;;  %v79_v2 = vld [vmem:[#allocation4 + $0x68] sm:$0xff]  ;;  %v78_v3 = vld [vmem:[#allocation4 + $0x60] sm:$0xff]  ;;  %v77_v4 = vld [vmem:[#allocation4 + $0x58] sm:$0xff]  ;;  %vm114_vm1 = vcmask 1040384  }
   0xf   :  { %v76_v5 = vld [vmem:[#allocation4 + $0x50] sm:$0xff]  ;;  %v75_v6 = vld [vmem:[#allocation4 + $0x48] sm:$0xff]  ;;  %v74_v7 = vld [vmem:[#allocation4 + $0x40] sm:$0xff]  ;;  %v111_v23 = vand.u32 127, %v110_v22 }
  0x10   :  { %84 = vmatpush.msra.mxu0 %v80_v1  ;;  %v73_v8 = vld [vmem:[#allocation4 + $0x38] sm:$0xff]  ;;  %v72_v9 = vld [vmem:[#allocation4 + $0x30] sm:$0xff]  ;;  %v71_v10 = vld [vmem:[#allocation4 + $0x28] sm:$0xff] }
  0x11   :  { %v70_v11 = vld [vmem:[#allocation4 + $0x20] sm:$0xff]  ;;  %v69_v12 = vld [vmem:[#allocation4 + $0x18] sm:$0xff]  ;;  %v68_v13 = vld [vmem:[#allocation4 + $0x10] sm:$0xff]  ;;  %vm112_vm0 = vcmp.lt.s32.totalorder %v111_v23, 16  ;;  %v119_v39 = vcvt.s32.f32 %v111_v23  ;;  %vm125_vm3 = vcmp.lt.s32.totalorder %v111_v23, 4 }
  0x12   :  { %85 = vmatpush.msra.mxu0 %v79_v2  ;;  %v67_v14 = vld [vmem:[#allocation4 + $0x8] sm:$0xff]  ;;  %v66_v15 = vld [vmem:[#allocation4] sm:$0xff]  ;;  %v65_v16 = vld [vmem:[#allocation2] sm:$0x1]  ;;  %v126_v53 = vsel %vm125_vm3, %v111_v23, 4 }
  0x13   :  { %v82_v17 = vld [vmem:[%s324_s2] sm:$0x1]  ;;  %v146_v30 = vld [vmem:[#allocation6 + $0x70] sm:$0xff]  ;;  %v145_v31 = vld [vmem:[#allocation6 + $0x68] sm:$0xff] }
  0x14   :  { %86 = vmatpush.msra.mxu0 %v78_v3  ;;  %v147_v29 = vld [vmem:[#allocation6 + $0x78] sm:$0xff]  ;;  %v144_v32 = vld [vmem:[#allocation6 + $0x60] sm:$0xff]  ;;  %v142_v34 = vld [vmem:[#allocation6 + $0x50] sm:$0xff] }
  0x15   :  { %149 = vmatpush.msra.mxu1 %v147_v29  ;;  %v143_v33 = vld [vmem:[#allocation6 + $0x58] sm:$0xff]  ;;  %v141_v35 = vld [vmem:[#allocation6 + $0x48] sm:$0xff]  ;;  %v140_v36 = vld [vmem:[#allocation6 + $0x40] sm:$0xff] }
  0x16   :  { %87 = vmatpush.msra.mxu0 %v77_v4  ;;  %v139_v37 = vld [vmem:[#allocation6 + $0x38] sm:$0xff]  ;;  %v138_v38 = vld [vmem:[#allocation6 + $0x30] sm:$0xff]  ;;  %v137_v43 = vld [vmem:[#allocation6 + $0x28] sm:$0xff] }
  0x17   :  { %150 = vmatpush.msra.mxu1 %v146_v30  ;;  %v136_v44 = vld [vmem:[#allocation6 + $0x20] sm:$0xff]  ;;  %v135_v45 = vld [vmem:[#allocation6 + $0x18] sm:$0xff]  ;;  %v134_v46 = vld [vmem:[#allocation6 + $0x10] sm:$0xff] }
  0x18   :  { %88 = vmatpush.msra.mxu0 %v76_v5  ;;  %v133_v47 = vld [vmem:[#allocation6 + $0x8] sm:$0xff]  ;;  %v132_v48 = vld [vmem:[#allocation6] sm:$0xff]  ;;  %v148_v58 = vld [vmem:[%s326_s4] sm:$0x1] }
  0x19   :  { %151 = vmatpush.msra.mxu1 %v145_v31 }
  0x1a   :  { %89 = vmatpush.msra.mxu0 %v75_v6 }
  0x1b   :  { %152 = vmatpush.msra.mxu1 %v144_v32 }
  0x1c   :  { %90 = vmatpush.msra.mxu0 %v74_v7 }
  0x1d   :  { %153 = vmatpush.msra.mxu1 %v143_v33 }
  0x1e   :  { %91 = vmatpush.msra.mxu0 %v73_v8 }
  0x1f   :  { %154 = vmatpush.msra.mxu1 %v142_v34 }
  0x20   :  { %92 = vmatpush.msra.mxu0 %v72_v9 }
  0x21   :  { %155 = vmatpush.msra.mxu1 %v141_v35 }
  0x22   :  { %93 = vmatpush.msra.mxu0 %v71_v10 }
  0x23   :  { %156 = vmatpush.msra.mxu1 %v140_v36 }
  0x24   :  { %94 = vmatpush.msra.mxu0 %v70_v11 }
  0x25   :  { %157 = vmatpush.msra.mxu1 %v139_v37 }
  0x26   :  { %95 = vmatpush.msra.mxu0 %v69_v12 }
  0x27   :  { %158 = vmatpush.msra.mxu1 %v138_v38 }
  0x28   :  { %96 = vmatpush.msra.mxu0 %v68_v13 }
  0x29   :  { %159 = vmatpush.msra.mxu1 %v137_v43 }
  0x2a   :  { %97 = vmatpush.msra.mxu0 %v67_v14 }
  0x2b   :  { %160 = vmatpush.msra.mxu1 %v136_v44 }
  0x2c   :  { %98 = vmatpush.msra.mxu0 %v66_v15 }
  0x2d   :  { %99 = vmatmul.f32.vlgmr.msra.gmra.mxu0 %v65_v16  ;;  %161 = vmatpush.msra.mxu1 %v135_v45 }
  0x2f   :  { %162 = vmatpush.msra.mxu1 %v134_v46 }
  0x31   :  { %163 = vmatpush.msra.mxu1 %v133_v47 }
  0x33   :  { %164 = vmatpush.msra.mxu1 %v132_v48 }
  0xaa   :  { %v100_v18 = vpop.f32.mrf.mxu0 }
  0xab   :  { %v101_v19 = vadd.f32 %v100_v18, %v82_v17 }
  0xad   :  { %v103_v20 = vmul.f32 %v101_v19, %v101_v19 }
  0xaf   :  { %104 = vrot.lane.b32.xlu0 %v103_v20, %s270_s9 }
  0xb7   :  { %107 = vrot.lane.b32.xlu0 %v103_v20, %s271_s10 }
 0x121   :  { %v105_v21 = vpop.permute.xlu0 %104 }
 0x122   :  { %v106_v24 = vadd.f32 %v105_v21, %v103_v20 }
 0x129   :  { %v108_v25 = vpop.permute.xlu0 %107 }
 0x12a   :  { %v109_v26 = vadd.f32 %v108_v25, %v106_v24 }
 0x12c   :  { %v113_v27 = vsel %vm112_vm0, %v109_v26, -1.0 }
 0x12d   :  { %v115_v28 = vsel %vm114_vm1, %v113_v27, -inf }
 0x12e   :  { %116 = vmax.xlane.f32.xlu1 %v115_v28 }
 0x1a1   :  { %v117_v40 = vpop.xlane.xlu1 %116 }
 0x1a2   :  { %vm118_vm2 = vcmp.eq.f32.partialorder %v113_v27, %v117_v40 }
 0x1a3   :  { %v120_v41 = vsel %vm118_vm2, %v119_v39, 128.0 }
 0x1a4   :  { %v121_v42 = vsel %vm114_vm1, %v120_v41, inf }
 0x1a5   :  { %122 = vmin.xlane.f32.xlu1 %v121_v42 }
 0x218   :  { %v123_v49 = vpop.xlane.xlu1 %122 }
 0x219   :  { %vm177_vm4 = vcmp.lt.s32.totalorder %v123_v49, 0  ;;  %v178_v50 = vceil.f32 %v123_v49  ;;  %v179_v51 = vfloor.f32 %v123_v49 }
 0x21b   :  { %v180_v52 = vsel %vm177_vm4, %v178_v50, %v179_v51 }
 0x21c   :  { %v181_v54 = vcvt.f32.s32 %v180_v52 }
 0x21e   :  { %v127_v55 = vshra.s32 %v181_v54, %v126_v53 }
 0x220   :  { %v128_v56 = vand.u32 1, %v127_v55 }
 0x222   :  { %v129_v57 = vcvt.s32.f32 %v128_v56 }
 0x224   :  { %176 = vmatmul.msk.f32.vlgmr.msra.gmra.mxu1 %vm125_vm3, %v129_v57 }
 0x2a1   :  { %v166_v59 = vpop.f32.mrf.mxu1 }
 0x2a2   :  { %v167_v60 = vadd.f32 %v166_v59, %v148_v58 }
 0x2a4   :  { %169 = vst [vmem:[%s327_s5] sm:$0x1] %v167_v60 }
 0x2a5   :  { %174 = vsyncpa [#allocation3], 1 }
 0x2a6   :  { %175 = vsyncpa [#allocation5], 1 }

</bundles_post_ra>
